<compile_context>
chip_gen: v6e
topology: v6e:2x2x1
jax: 0.10.0
libtpu: 0.0.40
codegen_flags: <defaults>
</compile_context>

<pallas_src>
import functools

import jax
import jax.numpy as jnp
from jax.experimental import pallas as pl
from jax.experimental.pallas import tpu as pltpu


_LANE = 128
_SUBLANE_ALIGN = 16                 # also keeps bf16 (16, 128) packing happy
_MAX_TB = 1024                      # max batch-tile rows
_MAX_TK = 2048                      # max feature-tile lanes
_VMEM_LIMIT_BYTES = 32 * 1024 * 1024  # <= scoped/physical VMEM on v5e, v6e and v7x


def _round_up(x, m):
    return (x + m - 1) // m * m


def _choose_tile(dim, align, max_tile):
    """Pick (tile, padded_dim, num_tiles) with tile <= max_tile and minimal padding."""
    padded = _round_up(dim, align)
    n = -(-padded // max_tile)                    # ceil
    tile = _round_up(-(-padded // n), align)      # balanced tile, aligned
    return tile, tile * n, n


def _review_classifier_kernel(x_ref, w_ref, b_ref, o_ref, acc_ref, *, apply_sigmoid):
    # x_ref:   (TB, TK) VMEM tile of the input
    # w_ref:   (1, TK)  VMEM tile of the (untransposed) Linear weight
    # b_ref:   (1, 1)   SMEM scalar bias
    # o_ref:   (TB, 1)  VMEM output tile
    # acc_ref: (TB, 1)  f32 VMEM scratch accumulator (lives across the feature axis)
    k = pl.program_id(1)

    @pl.when(k == 0)
    def _init():
        acc_ref[...] = jnp.zeros_like(acc_ref)

    # VPU broadcast-multiply + XLU lane reduction in f32 (avoids a 1-column MXU matmul).
    x = x_ref[...].astype(jnp.float32)
    w = w_ref[...].astype(jnp.float32)
    acc_ref[...] += jnp.sum(x * w, axis=-1, keepdims=True)

    @pl.when(k == pl.num_programs(1) - 1)
    def _finalize():
        y = acc_ref[...] + b_ref[0, 0]
        if apply_sigmoid:
            y = jax.nn.sigmoid(y)           # EUP, f32
        o_ref[...] = y.astype(o_ref.dtype)


def review_classifier_forward(x, weight, bias, apply_sigmoid=False, compute_dtype=None):
    """Forward pass equivalent to ReviewClassifier.forward.

    x:      (B, F) floating point
    weight: (1, F) float32 (PyTorch nn.Linear weight layout — NOT transposed)
    bias:   (1,)   float32
    compute_dtype: optional (e.g. jnp.bfloat16) — cast inputs to halve HBM traffic;
                   the kernel always accumulates in float32.
    returns: squeeze(x @ weight.T + bias), optionally sigmoid'd, float32.
    """
    B, F = x.shape
    assert weight.shape == (1, F) and bias.shape == (1,)

    if compute_dtype is not None:
        x = x.astype(compute_dtype)
        weight = weight.astype(compute_dtype)

    tb, b_pad, nb = _choose_tile(B, _SUBLANE_ALIGN, _MAX_TB)
    tk, f_pad, nk = _choose_tile(F, _LANE, _MAX_TK)

    if b_pad != B or f_pad != F:
        x = jnp.pad(x, ((0, b_pad - B), (0, f_pad - F)))
    if f_pad != F:
        weight = jnp.pad(weight, ((0, 0), (0, f_pad - F)))

    b_smem = bias.reshape(1, 1).astype(jnp.float32)
    itemsize = int(jnp.dtype(x.dtype).itemsize)

    kernel = functools.partial(_review_classifier_kernel, apply_sigmoid=apply_sigmoid)

    out = pl.pallas_call(
        kernel,
        out_shape=jax.ShapeDtypeStruct((b_pad, 1), jnp.float32),
        grid=(nb, nk),
        in_specs=[
            pl.BlockSpec((tb, tk), lambda i, k: (i, k)),   # x tile
            pl.BlockSpec((1, tk), lambda i, k: (0, k)),    # weight tile (constant across i)
            pl.BlockSpec(memory_space=pltpu.SMEM),         # bias scalar
        ],
        out_specs=pl.BlockSpec((tb, 1), lambda i, k: (i, 0)),
        scratch_shapes=[pltpu.VMEM((tb, 1), jnp.float32)],
        compiler_params=pltpu.CompilerParams(
            dimension_semantics=("parallel", "arbitrary"),
            vmem_limit_bytes=_VMEM_LIMIT_BYTES,
        ),
        cost_estimate=pl.CostEstimate(
            flops=2 * b_pad * f_pad,
            transcendentals=b_pad if apply_sigmoid else 0,
            bytes_accessed=b_pad * f_pad * itemsize + f_pad * itemsize + b_pad * 4,
        ),
    )(x, weight, b_smem)

    # Matches torch's .squeeze(): (B, 1) -> (B,)  (and (1, 1) -> () for B == 1).
    return jnp.squeeze(out[:B])


if __name__ == "__main__":
    key = jax.random.PRNGKey(0)
    k_x, k_w, k_b = jax.random.split(key, 3)

    batch = 8
    num_features = 32

    x = jax.random.normal(k_x, (batch, num_features), dtype=jnp.float32)
    # Deterministic synthetic params matching nn.Linear(num_features, 1) shapes.
    bound = 1.0 / (num_features ** 0.5)
    weight = jax.random.uniform(k_w, (1, num_features), jnp.float32, -bound, bound)
    bias = jax.random.uniform(k_b, (1,), jnp.float32, -bound, bound)

    # Kernel results: f32 logits, f32 sigmoid probs, and the bf16-input fast path.
    y = review_classifier_forward(x, weight, bias, apply_sigmoid=False)
    y_sig = review_classifier_forward(x, weight, bias, apply_sigmoid=True)
    y_bf16 = review_classifier_forward(x, weight, bias, apply_sigmoid=False,
                                       compute_dtype=jnp.bfloat16)
    jax.block_until_ready((y, y_sig, y_bf16))

    # Reference check against plain JAX at full f32 precision (same math as the PyTorch module).
    y_ref = jnp.squeeze(
        jnp.matmul(x, weight.T, precision=jax.lax.Precision.HIGHEST) + bias)
    y_sig_ref = jax.nn.sigmoid(y_ref)
    assert y.shape == (batch,)
    assert jnp.allclose(y, y_ref, atol=1e-4, rtol=1e-4), "logit mismatch"
    assert jnp.allclose(y_sig, y_sig_ref, atol=1e-4, rtol=1e-4), "sigmoid mismatch"
    assert jnp.allclose(y_bf16, y_ref, atol=5e-2, rtol=5e-2), "bf16 logit mismatch"

    print("KERNEL_OK")
</pallas_src>

<mosaic_0001>
module attributes {stable_mosaic.version = 11 : i64} {
  func.func @_review_classifier_kernel(%arg0: i32, %arg1: i32, %arg2: memref<16x128xf32, #tpu.memory_space<vmem>>, %arg3: memref<1x128xf32, #tpu.memory_space<vmem>>, %arg4: memref<1x1xf32, #tpu.memory_space<smem>>, %arg5: memref<16x1xf32, #tpu.memory_space<vmem>>, %arg6: memref<16x1xf32, #tpu.memory_space<vmem>>) attributes {dimension_semantics = [#tpu.dimension_semantics<parallel>, #tpu.dimension_semantics<arbitrary>], iteration_bounds = array<i64: 1, 1>, scalar_prefetch = 0 : i64, scratch_operands = 1 : i64, tpu.core_type = #tpu.core_type<tc>, window_params = [{transform_indices = @transform_0, window_bounds = array<i64: 16, 128>}, {transform_indices = @transform_1, window_bounds = array<i64: 1, 128>}, {transform_indices = @transform_2, window_bounds = array<i64: 1, 1>}, {transform_indices = @transform_3, window_bounds = array<i64: 16, 1>}]} {
    %c0_i32 = arith.constant 0 : i32
    %0 = arith.cmpi eq, %arg1, %c0_i32 : i32
    %1 = arith.extui %0 : i1 to i32
    %c0_i32_0 = arith.constant 0 : i32
    %2 = arith.cmpi ne, %1, %c0_i32_0 : i32
    scf.if %2 {
      %cst_10 = arith.constant 0.000000e+00 : f32
      %15 = vector.broadcast %cst_10 : f32 to vector<16x1xf32>
      %c0_11 = arith.constant 0 : index
      %c0_12 = arith.constant 0 : index
      %16 = vector.load %arg6[%c0_11, %c0_12] : memref<16x1xf32, #tpu.memory_space<vmem>>, vector<16x1xf32>
      tpu.vector_store %arg6[%c0_11, %c0_12], %15 {strides = array<i32>} : memref<16x1xf32, #tpu.memory_space<vmem>>, vector<16x1xf32>,
    } else {
    }
    %c0 = arith.constant 0 : index
    %c0_1 = arith.constant 0 : index
    %3 = vector.load %arg2[%c0, %c0_1] : memref<16x128xf32, #tpu.memory_space<vmem>>, vector<16x128xf32>
    %c0_2 = arith.constant 0 : index
    %c0_3 = arith.constant 0 : index
    %4 = vector.load %arg3[%c0_2, %c0_3] : memref<1x128xf32, #tpu.memory_space<vmem>>, vector<1x128xf32>
    %c0_4 = arith.constant 0 : index
    %c0_5 = arith.constant 0 : index
    %5 = vector.load %arg6[%c0_4, %c0_5] : memref<16x1xf32, #tpu.memory_space<vmem>>, vector<16x1xf32>
    %6 = vector.broadcast %4 : vector<1x128xf32> to vector<16x128xf32>
    %7 = arith.mulf %3, %6 : vector<16x128xf32>
    %cst = arith.constant dense<0.000000e+00> : vector<16xf32>
    %8 = vector.multi_reduction <add>, %7, %cst [1] : vector<16x128xf32> to vector<16xf32>
    %9 = vector.shape_cast %8 : vector<16xf32> to vector<16x1xf32>
    %10 = arith.addf %5, %9 : vector<16x1xf32>
    %c0_6 = arith.constant 0 : index
    %c0_7 = arith.constant 0 : index
    %11 = vector.load %arg6[%c0_6, %c0_7] : memref<16x1xf32, #tpu.memory_space<vmem>>, vector<16x1xf32>
    tpu.vector_store %arg6[%c0_6, %c0_7], %10 {strides = array<i32>} : memref<16x1xf32, #tpu.memory_space<vmem>>, vector<16x1xf32>,
    %c0_i32_8 = arith.constant 0 : i32
    %12 = arith.cmpi eq, %arg1, %c0_i32_8 : i32
    %13 = arith.extui %12 : i1 to i32
    %c0_i32_9 = arith.constant 0 : i32
    %14 = arith.cmpi ne, %13, %c0_i32_9 : i32
    scf.if %14 {
      %c0_10 = arith.constant 0 : index
      %c0_11 = arith.constant 0 : index
      %15 = vector.load %arg6[%c0_10, %c0_11] : memref<16x1xf32, #tpu.memory_space<vmem>>, vector<16x1xf32>
      %c0_12 = arith.constant 0 : index
      %c0_13 = arith.constant 0 : index
      %16 = memref.load %arg4[%c0_12, %c0_13] : memref<1x1xf32, #tpu.memory_space<smem>>
      %17 = vector.broadcast %16 : f32 to vector<16x1xf32>
      %18 = arith.addf %15, %17 : vector<16x1xf32>
      %c0_14 = arith.constant 0 : index
      %c0_15 = arith.constant 0 : index
      %19 = vector.load %arg5[%c0_14, %c0_15] : memref<16x1xf32, #tpu.memory_space<vmem>>, vector<16x1xf32>
      tpu.vector_store %arg5[%c0_14, %c0_15], %18 {strides = array<i32>} : memref<16x1xf32, #tpu.memory_space<vmem>>, vector<16x1xf32>,
    } else {
    }
    return
  }
  func.func @transform_0(%arg0: i32, %arg1: i32) -> (i32, i32) {
    %c0_i32 = arith.constant 0 : i32
    return %arg0, %arg1 : i32, i32
  }
  func.func @transform_1(%arg0: i32, %arg1: i32) -> (i32, i32) {
    %c0_i32 = arith.constant 0 : i32
    %c0_i32_0 = arith.constant 0 : i32
    return %c0_i32, %arg1 : i32, i32
  }
  func.func @transform_2(%arg0: i32, %arg1: i32) -> (i32, i32) {
    %c0_i32 = arith.constant 0 : i32
    %c0_i32_0 = arith.constant 0 : i32
    %c0_i32_1 = arith.constant 0 : i32
    return %c0_i32, %c0_i32_0 : i32, i32
  }
  func.func @transform_3(%arg0: i32, %arg1: i32) -> (i32, i32) {
    %c0_i32 = arith.constant 0 : i32
    %c0_i32_0 = arith.constant 0 : i32
    return %arg0, %c0_i32 : i32, i32
  }
}

</mosaic_0001>

<bundles_post_ra>
// kernel: tpu_custom_call.1
= control target key start
LH: loop header
LB: loop body
LE: loop exit
PB: predicated region body
PF: predicated region fallthrough
CT: control target
= control target key end

     0   :  { %9 = vsyncpa [#allocation5], 0  ;;  %s101_s12 = smov [#allocation4]   ;;  %s146_s0 = inlined_call_operand.hbm [shape: f32[16,128], index: 0, kind: input, shape index: {}]   ;;  %s147_s1 = inlined_call_operand.vmem [shape: f32[1,128], index: 1, kind: input, shape index: {}]   ;;  %s148_s2 = inlined_call_operand.<no memory space> [shape: f32[1,1], index: 2, kind: input, shape index: {}]   ;;  %s149_s3 = inlined_call_operand.vmem [shape: f32[16,1], index: 3, kind: output, shape index: {}]  }
   0x1   :  { %s15_s13 = sshll.u32 %s101_s12, 4  ;;  %s16_s13 = int_to_ptr.vmem [resolvable:$true] %s15_s13 }
   0x2   :  { %s87_s14 = scalar_lea.vmem %s16_s13, 256  ;;  %p92_p1 = scmp.lt.s32.totalorder %s16_s13, %s16_s13 }
   0x3   :  { %p88_p0 = scmp.ne.s32.totalorder %s16_s13, %s87_s14  ;;  %p93_p2 = scmp.lt.s32.totalorder %s87_s14, %s87_s14 }
   0x5   :  { %p94_p3 = por %p93_p2, %p92_p1 }
   0x7   :  { %p95_p4 = pnand %p94_p3, %p88_p0 }
   0x9   :  { %98 = shalt.err (!%p95_p4)
}
   0xa   :  { %s102_s15 = smov 128   ;;  %s103_s16 = smov 8  }
   0xb   :  { %21 = dma.hbm_to_vmem [thread:$0]  %s146_s0, 256, %s16_s13, [#allocation5], %s102_s15, %s102_s15, %s103_s16  }
   0xc   :  { %99 = dma.done.wait [#allocation5], 256  }
   0xd   :  { %100 = vsyncadd [#allocation5], 4294967040  ;;  %vm33_vm0 = vcmask 7168   ;;  %v104_v0 = vmov 0.0   ;;  %v36_v1 = vld [vmem:[#allocation4] sm:$0xff]  ;;  %v37_v3 = vld [vmem:[#allocation4 + $0x8] sm:$0xff]  ;;  %v64_v12 = vstv %s148_s2 }
   0xe   :  { %34 = vst.msk [vmem:[#allocation2] sm:$0xff] %vm33_vm0, %v104_v0  ;;  %35 = vst.msk [vmem:[#allocation2 + $0x8] sm:$0xff] %vm33_vm0, %v104_v0  ;;  %v74_v2 = vld [vmem:[%s147_s1] ss:$0 sm:$0xff] }
   0xf   :  { %v47_v4 = vmul.f32 %v74_v2, %v36_v1  ;;  %v48_v5 = vmul.f32 %v74_v2, %v37_v3 }
  0x11   :  { %49 = vadd.xlane.f32.xlu0 %v47_v4 }
  0x15   :  { %51 = vadd.xlane.f32.xlu0 %v48_v5  ;;  %v39_v6 = vld [vmem:[#allocation2] sm:$0xff]  ;;  %v40_v9 = vld [vmem:[#allocation2 + $0x8] sm:$0xff] }
  0x9a   :  { %v50_v7 = vpop.xlane.xlu0 %49 }
  0x9b   :  { %v53_v8 = vadd.f32 %v50_v7, %v39_v6 }
  0x9d   :  { %56 = vst.msk [vmem:[#allocation2] sm:$0xff] %vm33_vm0, %v53_v8 }
  0x9e   :  { %v52_v10 = vpop.xlane.xlu0 %51 }
  0x9f   :  { %v54_v11 = vadd.f32 %v52_v10, %v40_v9 }
  0xa1   :  { %57 = vst.msk [vmem:[#allocation2 + $0x8] sm:$0xff] %vm33_vm0, %v54_v11 }
  0xa4   :  { %v61_v13 = vld [vmem:[#allocation2] sm:$0xff] }
  0xa5   :  { %v65_v14 = vadd.f32 %v64_v12, %v61_v13 }
  0xa7   :  { %67 = vst.msk [vmem:[%s149_s3] sm:$0xff] %vm33_vm0, %v65_v14 }
  0xa8   :  { %v62_v15 = vld [vmem:[#allocation2 + $0x8] sm:$0xff] }
  0xa9   :  { %v66_v16 = vadd.f32 %v64_v12, %v62_v15 }
  0xab   :  { %68 = vst.msk [vmem:[%s149_s3 + $0x8] sm:$0xff] %vm33_vm0, %v66_v16 }
  0xac   :  { %73 = vsyncpa [#allocation5], 1 }

</bundles_post_ra>
